<compile_context>
chip_gen: v7x
topology: tpu7x:2x2x1
jax: 0.10.0
libtpu: 0.0.40
codegen_flags: <defaults>
</compile_context>

<pallas_src>
import functools

import jax
import jax.numpy as jnp
from jax.experimental import pallas as pl
from jax.experimental.pallas import tpu as pltpu


def _round_up(a: int, b: int) -> int:
    return ((a + b - 1) // b) * b


def _fm_kernel(x_ref, vw_ref, s_ref, b_ref, o_ref, *, fm_k):
    """One batch tile of the factorization machine.

    x_ref : (TB, F)   f32  VMEM (streamed / double-buffered over the grid)
    vw_ref: (F, K+1)  f32  VMEM-resident: [v | linear_w]
    s_ref : (F, 1)    f32  VMEM-resident: -0.5 * rowsum(v**2)
    b_ref : (1, 1)    f32  SMEM scalar bias
    o_ref : (1, TB)   f32  lane-dense output row (batch on the lane axis)
    """
    x = x_ref[...]                                                        # (TB, F)

    # Single K-wide interaction matmul with the linear weight fused as column K.
    z = jnp.dot(x, vw_ref[...], preferred_element_type=jnp.float32)      # (TB, K+1)
    pair = z[:, :fm_k]                                                    # (TB, K) = x @ v
    lin = z[:, fm_k:fm_k + 1]                                             # (TB, 1) = x @ w

    # Collapsed inter2 term: -0.5 * (x**2) @ rowsum(v**2)  (one tiny N=1 matmul,
    # hidden behind the x DMA since the kernel is HBM-bound).
    inter2 = jnp.dot(x * x, s_ref[...], preferred_element_type=jnp.float32)  # (TB, 1)

    col = (lin + inter2
           + 0.5 * jnp.sum(pair * pair, axis=1, keepdims=True)
           + b_ref[0, 0])                                                 # (TB, 1)

    # Dropout: identity (inference).  Store lane-dense.
    o_ref[...] = jnp.transpose(col, (1, 0))                               # (1, TB)


def factorization_machine(x, lin_w, lin_b, v, *, tile_batch=None):
    """x: (B, F); lin_w: (1, F); lin_b: (1,); v: (F, K).  Returns (B,) float32."""
    B, F = x.shape
    K = v.shape[1]

    x32 = x.astype(jnp.float32)
    v32 = v.astype(jnp.float32)

    # Weight-derived constants, computed once (hoisted out of the grid loop).
    vw = jnp.concatenate(
        [v32, lin_w.astype(jnp.float32).reshape(F, 1)], axis=1)          # (F, K+1)
    s_col = -0.5 * jnp.sum(v32 * v32, axis=1, keepdims=True)             # (F, 1)
    b_smem = lin_b.astype(jnp.float32).reshape(1, 1)                     # (1, 1)

    # ---- batch tiling -------------------------------------------------------
    if tile_batch is None:
        # The x tile occupies TB * 4 * round_up(F, 128) bytes in VMEM (lane
        # padding), so size TB from a ~2 MiB-per-buffer budget.  In-kernel
        # temporaries scale the same way; with a row cap of 8192 the total
        # stays comfortably under the 32 MiB scoped VMEM limit on all chips.
        row_bytes = 4 * _round_up(F, 128)
        tile_batch = ((2 * 2 ** 20) // row_bytes) // 128 * 128
        tile_batch = max(256, min(8192, tile_batch))

    if B <= tile_batch:
        TB = _round_up(max(B, 1), 8)        # single tile: blocks == full arrays
    else:
        # Balance tiles across the grid so the last tile carries minimal padding.
        n_tiles = -(-B // tile_batch)
        TB = _round_up(-(-B // n_tiles), 128)   # lane-dense (1, TB) output blocks
    B_pad = _round_up(B, TB)
    grid = (B_pad // TB,)

    if B_pad != B:
        # Zero padded rows produce just the bias, which is sliced off below.
        x32 = jnp.pad(x32, ((0, B_pad - B), (0, 0)))

    out = pl.pallas_call(
        functools.partial(_fm_kernel, fm_k=K),
        out_shape=jax.ShapeDtypeStruct((1, B_pad), jnp.float32),
        grid=grid,
        in_specs=[
            pl.BlockSpec((TB, F), lambda i: (i, 0)),            # x: streamed, double-buffered
            pl.BlockSpec((F, K + 1), lambda i: (0, 0)),         # [v | w]: VMEM-resident
            pl.BlockSpec((F, 1), lambda i: (0, 0)),             # -0.5*rowsum(v^2): resident
            pl.BlockSpec(memory_space=pltpu.MemorySpace.SMEM),  # bias scalar in SMEM
        ],
        out_specs=pl.BlockSpec((1, TB), lambda i: (0, i)),      # lane-dense output row
        compiler_params=pltpu.CompilerParams(
            dimension_semantics=("parallel",),                  # shard batch tiles across TCs
            vmem_limit_bytes=32 * 1024 * 1024,                  # safe on v5e/v6e/v7x
        ),
    )(x32, vw, s_col, b_smem)

    return out[0, :B]


def _reference(x, lin_w, lin_b, v):
    w = (x @ lin_w.T + lin_b)[:, 0]
    inter1 = x @ v
    inter2 = (x ** 2) @ (v ** 2)
    inter = 0.5 * (inter1 ** 2 - inter2)
    return w + jnp.sum(inter, axis=1)


if __name__ == "__main__":
    factor_size = 32
    fm_k = 8

    key = jax.random.PRNGKey(0)
    kx1, kx2, kw, kb, kv = jax.random.split(key, 5)

    # Deterministic parameter init (shapes follow the PyTorch module __init__).
    bound = 1.0 / (factor_size ** 0.5)
    lin_w = jax.random.uniform(kw, (1, factor_size), jnp.float32, -bound, bound)
    lin_b = jax.random.uniform(kb, (1,), jnp.float32, -bound, bound)
    v = jax.random.normal(kv, (factor_size, fm_k), dtype=jnp.float32)

    # Case 1: small batch, single tile.
    x1 = jax.random.normal(kx1, (8, factor_size), dtype=jnp.float32)
    out1 = factorization_machine(x1, lin_w, lin_b, v)
    jax.block_until_ready(out1)
    ref1 = _reference(x1, lin_w, lin_b, v)
    assert out1.shape == (8,)
    assert jnp.allclose(out1, ref1, atol=1e-3, rtol=1e-3), "mismatch vs reference (single tile)"

    # Case 2: multi-tile grid (exercises batch tiling, padding and pipelining).
    x2 = jax.random.normal(kx2, (300, factor_size), dtype=jnp.float32)
    out2 = factorization_machine(x2, lin_w, lin_b, v, tile_batch=128)
    jax.block_until_ready(out2)
    ref2 = _reference(x2, lin_w, lin_b, v)
    assert out2.shape == (300,)
    assert jnp.allclose(out2, ref2, atol=1e-3, rtol=1e-3), "mismatch vs reference (multi tile)"

    print("KERNEL_OK")
</pallas_src>

<mosaic_0001>
module attributes {stable_mosaic.version = 11 : i64} {
  func.func @_fm_kernel(%arg0: i32, %arg1: memref<8x32xf32, #tpu.memory_space<vmem>>, %arg2: memref<32x9xf32, #tpu.memory_space<vmem>>, %arg3: memref<32x1xf32, #tpu.memory_space<vmem>>, %arg4: memref<1x1xf32, #tpu.memory_space<smem>>, %arg5: memref<1x8xf32, #tpu.memory_space<vmem>>) attributes {dimension_semantics = [#tpu.dimension_semantics<parallel>], iteration_bounds = array<i64: 1>, scalar_prefetch = 0 : i64, scratch_operands = 0 : i64, tpu.core_type = #tpu.core_type<tc>, window_params = [{transform_indices = @transform_0, window_bounds = array<i64: 8, 32>}, {pipeline_mode = #tpu.pipeline_mode<synchronous>, transform_indices = @transform_1, window_bounds = array<i64: 32, 9>}, {pipeline_mode = #tpu.pipeline_mode<synchronous>, transform_indices = @transform_2, window_bounds = array<i64: 32, 1>}, {transform_indices = @transform_3, window_bounds = array<i64: 1, 1>}, {transform_indices = @transform_4, window_bounds = array<i64: 1, 8>}]} {
    %c0 = arith.constant 0 : index
    %c0_0 = arith.constant 0 : index
    %0 = vector.load %arg1[%c0, %c0_0] : memref<8x32xf32, #tpu.memory_space<vmem>>, vector<8x32xf32>
    %c0_1 = arith.constant 0 : index
    %c0_2 = arith.constant 0 : index
    %1 = vector.load %arg2[%c0_1, %c0_2] : memref<32x9xf32, #tpu.memory_space<vmem>>, vector<32x9xf32>
    %cst = arith.constant dense<0.000000e+00> : vector<8x9xf32>
    %2 = tpu.matmul %0, %1, %cst {dimension_numbers = #tpu.dot_dimension_numbers<[1], [0], [0], [1], [0, 0, 1, 1], [], []>} : vector<8x32xf32>, vector<32x9xf32>, vector<8x9xf32> -> vector<8x9xf32>
    %3 = vector.extract_strided_slice %2 {offsets = [0, 0], sizes = [8, 8], strides = [1, 1]} : vector<8x9xf32> to vector<8x8xf32>
    %4 = vector.extract_strided_slice %2 {offsets = [0, 8], sizes = [8, 1], strides = [1, 1]} : vector<8x9xf32> to vector<8x1xf32>
    %5 = arith.mulf %0, %0 : vector<8x32xf32>
    %c0_3 = arith.constant 0 : index
    %c0_4 = arith.constant 0 : index
    %6 = vector.load %arg3[%c0_3, %c0_4] : memref<32x1xf32, #tpu.memory_space<vmem>>, vector<32x1xf32>
    %cst_5 = arith.constant dense<0.000000e+00> : vector<8x1xf32>
    %7 = tpu.matmul %5, %6, %cst_5 {dimension_numbers = #tpu.dot_dimension_numbers<[1], [0], [0], [1], [0, 0, 1, 1], [], []>} : vector<8x32xf32>, vector<32x1xf32>, vector<8x1xf32> -> vector<8x1xf32>
    %8 = arith.addf %4, %7 : vector<8x1xf32>
    %9 = arith.mulf %3, %3 : vector<8x8xf32>
    %cst_6 = arith.constant dense<0.000000e+00> : vector<8xf32>
    %10 = vector.multi_reduction <add>, %9, %cst_6 [1] : vector<8x8xf32> to vector<8xf32>
    %11 = vector.shape_cast %10 : vector<8xf32> to vector<8x1xf32>
    %cst_7 = arith.constant 5.000000e-01 : f32
    %12 = vector.broadcast %cst_7 : f32 to vector<8x1xf32>
    %13 = arith.mulf %12, %11 : vector<8x1xf32>
    %14 = arith.addf %8, %13 : vector<8x1xf32>
    %c0_8 = arith.constant 0 : index
    %c0_9 = arith.constant 0 : index
    %15 = memref.load %arg4[%c0_8, %c0_9] : memref<1x1xf32, #tpu.memory_space<smem>>
    %16 = vector.broadcast %15 : f32 to vector<8x1xf32>
    %17 = arith.addf %14, %16 : vector<8x1xf32>
    %18 = tpu.transpose %17, [1, 0] : vector<8x1xf32> -> vector<1x8xf32>
    %c0_10 = arith.constant 0 : index
    %c0_11 = arith.constant 0 : index
    %19 = vector.load %arg5[%c0_10, %c0_11] : memref<1x8xf32, #tpu.memory_space<vmem>>, vector<1x8xf32>
    tpu.vector_store %arg5[%c0_10, %c0_11], %18 {strides = array<i32>} : memref<1x8xf32, #tpu.memory_space<vmem>>, vector<1x8xf32>,
    return
  }
  func.func @transform_0(%arg0: i32) -> (i32, i32) {
    %c0_i32 = arith.constant 0 : i32
    %c0_i32_0 = arith.constant 0 : i32
    return %arg0, %c0_i32 : i32, i32
  }
  func.func @transform_1(%arg0: i32) -> (i32, i32) {
    %c0_i32 = arith.constant 0 : i32
    %c0_i32_0 = arith.constant 0 : i32
    %c0_i32_1 = arith.constant 0 : i32
    return %c0_i32, %c0_i32_0 : i32, i32
  }
  func.func @transform_2(%arg0: i32) -> (i32, i32) {
    %c0_i32 = arith.constant 0 : i32
    %c0_i32_0 = arith.constant 0 : i32
    %c0_i32_1 = arith.constant 0 : i32
    return %c0_i32, %c0_i32_0 : i32, i32
  }
  func.func @transform_3(%arg0: i32) -> (i32, i32) {
    %c0_i32 = arith.constant 0 : i32
    %c0_i32_0 = arith.constant 0 : i32
    %c0_i32_1 = arith.constant 0 : i32
    return %c0_i32, %c0_i32_0 : i32, i32
  }
  func.func @transform_4(%arg0: i32) -> (i32, i32) {
    %c0_i32 = arith.constant 0 : i32
    %c0_i32_0 = arith.constant 0 : i32
    return %c0_i32, %arg0 : i32, i32
  }
}

</mosaic_0001>

<bundles_post_ra>
// kernel: tpu_custom_call.1
= control target key start
LH: loop header
LB: loop body
LE: loop exit
PB: predicated region body
PF: predicated region fallthrough
CT: control target
= control target key end

     0   :  { %v319_v3 = vmov 0.0|0.0   ;;  %vm320_vm0 = vmmov 0   ;;  %v321_v6 = vmov 0.0   ;;  %s392_s0 = inlined_call_operand.vmem [shape: f32[8,32], index: 0, kind: input, shape index: {}]   ;;  %s393_s1 = inlined_call_operand.vmem [shape: f32[32,9], index: 1, kind: input, shape index: {}]   ;;  %s394_s2 = inlined_call_operand.vmem [shape: f32[32,1], index: 2, kind: input, shape index: {}]   ;;  %s395_s3 = inlined_call_operand.<no memory space> [shape: f32[1,1], index: 3, kind: input, shape index: {}]   ;;  %s396_s4 = inlined_call_operand.hbm [shape: f32[1,8], index: 4, kind: output, shape index: {}]  }
   0x1   :  { %v20_v0 = vld [vmem:[%s393_s1] sm:$0xff]  ;;  %v21_v1 = vld [vmem:[%s393_s1 + $0x8] sm:$0xff]  ;;  %v22_v2 = vld [vmem:[%s393_s1 + $0x10] sm:$0xff]  ;;  %277 = vmatprep.subr.bf16.mxu0 %v319_v3  ;;  %263 = vmatprep.mubr.msk.f32.mxu0 %vm320_vm0, %v321_v6 }
   0x2   :  { %v278_v4 = vpack.c.bf16 %v21_v1, %v20_v0  ;;  %v23_v5 = vld [vmem:[%s393_s1 + $0x18] sm:$0xff]  ;;  %v99_v7 = vld [vmem:[%s394_s2] sm:$0xff]  ;;  %283 = vmatprep.subr.bf16.mxu1 %v319_v3  ;;  %v100_v8 = vld [vmem:[%s394_s2 + $0x8] sm:$0xff]  ;;  %274 = vmatprep.mubr.msk.f32.mxu1 %vm320_vm0, %v321_v6 }
   0x3   :  { %v101_v9 = vld [vmem:[%s394_s2 + $0x10] sm:$0xff]  ;;  %v102_v10 = vld [vmem:[%s394_s2 + $0x18] sm:$0xff]  ;;  %v281_v11 = vpack.c.bf16 %v23_v5, %v22_v2  ;;  %v284_v12 = vpack.c.bf16 %v100_v8, %v99_v7 }
   0x4   :  { %279 = vmatpush3.bf16.msra.mxu0 %v278_v4 }
   0x5   :  { %10 = vsyncpa [#allocation4], 0  ;;  %280 = vmatprep.subr.bf16.mxu0 %v319_v3  ;;  %285 = vmatpush3.bf16.msra.mxu1 %v284_v12  ;;  %v287_v13 = vpack.c.bf16 %v102_v10, %v101_v9  ;;  %v19_v14 = vld [vmem:[%s392_s0] sm:$0xff]  ;;  %vm24_vm1 = vcmask 261120   ;;  %vm182_vm2 = vcmask 64512   ;;  %s322_s2 = smov 8   ;;  %v189_v26 = vstv %s395_s3 }
   0x6   :  { %286 = vmatprep.subr.bf16.mxu1 %v319_v3  ;;  %v98_v15 = vmul.f32 %v19_v14, %v19_v14  ;;  %s323_s7 = smov 120   ;;  %s324_s8 = smov [#allocation3]   ;;  %vm227_vm3 = vcmask 57344  }
   0x7   :  { %s235_s9 = sshll.u32 %s324_s8, 4  ;;  %s236_s9 = int_to_ptr.vmem [resolvable:$true] %s235_s9 }
   0x8   :  { %282 = vmatpush3.bf16.msra.mxu0 %v281_v11  ;;  %s295_s10 = scalar_lea.vmem %s236_s9, 16  ;;  %s299_s11 = scalar_lea.vmem %s236_s9, 32 }
   0x9   :  { %288 = vmatpush3.bf16.msra.mxu1 %v287_v13  ;;  %p296_p0 = scmp.ne.s32.totalorder %s236_s9, %s295_s10  ;;  %p300_p1 = scmp.lt.s32.totalorder %s236_s9, %s236_s9 }
   0xa   :  { %p301_p2 = scmp.lt.s32.totalorder %s299_s11, %s295_s10 }
   0xb   :  { %264 = vmatmul.mubr.msk.f32.vlgmr.msra.gmra.mrb[0].mxu0 %vm24_vm1, %v19_v14 }
   0xc   :  { %275 = vmatmul.mubr.msk.f32.vlgmr.msra.gmra.mrb[0].mxu1 %vm24_vm1, %v98_v15  ;;  %p302_p3 = por %p301_p2, %p300_p1 }
   0xe   :  { %p303_p4 = pnand %p302_p3, %p296_p0 }
  0xde   :  { %v94_v16 = vpop.f32.mrb[0].mxu0 }
  0xdf   :  { %v265_v17 = vpop.f32.mrb[1].mxu0  ;;  %v181_v18 = vmul.f32 %v94_v16, %v94_v16  ;;  %v172_v19 = vpop.f32.mrb[0].mxu1 }
  0xe0   :  { %v276_v21 = vpop.f32.mrb[1].mxu1 }
  0xe1   :  { %v183_v20 = vsel %vm182_vm2, %v181_v18, 0.0 }
  0xe2   :  { %184 = vadd.xlane.f32.xlu0 %v183_v20 }
  0xf8   :  { %177 = vrot.lane.b32.xlu0 %v172_v19, %s322_s2 }
 0x16f   :  { %v185_v22 = vpop.xlane.xlu0 %184 }
 0x170   :  { %v186_v24 = vmul.f32 0.5, %v185_v22 }
 0x173   :  { %v178_v23 = vpop.permute.xlu0 %177 }
 0x174   :  { %v180_v25 = vadd.f32 %v178_v23, %v94_v16 }
 0x176   :  { %v187_v27 = vadd.f32 %v186_v24, %v180_v25 }
 0x178   :  { %v190_v28 = vadd.f32 %v189_v26, %v187_v27 }
 0x17a   :  { %192 = vrot.lane.b32.xlu1 %v190_v28, %s323_s7 }
 0x1ec   :  { %v193_v29 = vpop.permute.xlu1 %192 }
 0x1ed   :  { %195 = vxpose.xlu1.b32.start.end [1/1] (short) (narrow) %v193_v29, 8 }
 0x26d   :  { %v211_v30 = vpop.trf.xlu1 }
 0x26e   :  { %228 = vst.msk [vmem:[#allocation3] sm:$0x1] %vm227_vm3, %v211_v30 }
 0x26f   :  { %306 = shalt.err (!%p303_p4)
}
 0x270   :  { %s307_s13 = scalar_lea.hbm %s396_s4, 16 }
 0x271   :  { %p308_p5 = scmp.ne.s32.totalorder %s396_s4, %s307_s13  ;;  %p311_p6 = scmp.lt.u32.totalorder %s307_s13, %s396_s4 }
 0x273   :  { %p313_p7 = pnand %p311_p6, %p308_p5 }
 0x275   :  { %316 = shalt.err (!%p313_p7)
}
 0x276   :  { %238 = dma.vmem_to_hbm [thread:$0]  %s236_s9, 16, %s396_s4, [#allocation4]  }
 0x277   :  { %317 = dma.done.wait [#allocation4], 16  }
 0x278   :  { %318 = vsyncadd [#allocation4], 4294967280 }
 0x279   :  { %242 = vsyncpa [#allocation4], 1 }

</bundles_post_ra>
